<compile_context>
chip_gen: v7x
topology: tpu7x:2x2x1
jax: 0.10.0
libtpu: 0.0.40
codegen_flags: <defaults>
</compile_context>

<pallas_src>
import functools
import math

import jax
import jax.numpy as jnp
from jax import lax
from jax.experimental import pallas as pl
from jax.experimental.pallas import tpu as pltpu


def _attend_and_store(q_all, kv_all, cdt, o_ref, *, n_heads, dim_attn, dim_val,
                      seq_q, seq_k, approx_recip):
    """q_all: (Bt*seq_q, H*A) f32;  kv_all: (Bt*seq_k, H*A + H*D) f32.

    Writes sum_h softmax(Q_h K_h^T) V'_h to o_ref, where the output projection
    (fc) has already been folded into V' by the wrapper.
    """
    ha = n_heads * dim_attn
    bt = q_all.shape[0] // seq_q
    for b in range(bt):                                    # static, small
        r0q, r1q = b * seq_q, (b + 1) * seq_q
        r0k, r1k = b * seq_k, (b + 1) * seq_k
        qb = q_all[r0q:r1q, :].astype(cdt)                 # (Sq, H*A)
        kb = kv_all[r0k:r1k, :ha].astype(cdt)              # (Sk, H*A)
        vb = kv_all[r0k:r1k, ha:].astype(cdt)              # (Sk, H*D)
        acc = jnp.zeros((seq_q, dim_val), jnp.float32)
        for h in range(n_heads):                           # static, small
            qh = qb[:, h * dim_attn:(h + 1) * dim_attn]    # (Sq, A)
            kh = kb[:, h * dim_attn:(h + 1) * dim_attn]    # (Sk, A)
            vh = vb[:, h * dim_val:(h + 1) * dim_val]      # (Sk, D)

            # scores: contract the last dim of both operands (no transpose);
            # 1/sqrt(dim_attn) is already folded into Wq.
            s = lax.dot_general(qh, kh, (((1,), (1,)), ((), ())),
                                preferred_element_type=jnp.float32)  # (Sq, Sk) f32

            # numerically-stable softmax, f32; divide -> EUP reciprocal (fast path)
            m = jnp.max(s, axis=-1, keepdims=True)
            e = jnp.exp(s - m)
            l = jnp.sum(e, axis=-1, keepdims=True)
            p = (e * pl.reciprocal(l, approx=approx_recip)).astype(cdt)

            # fc folded into V' -> accumulate heads directly into (Sq, D)
            acc = acc + jnp.dot(p, vh, preferred_element_type=jnp.float32)
        o_ref[r0q:r1q, :] = acc.astype(o_ref.dtype)


def _mha_self_kernel(x_ref, w_ref, o_ref, *, n_heads, dim_attn, dim_val, seq,
                     approx_recip):
    """Self-attention: one fused (rows, D) @ (D, 2*H*A + H*D) projection."""
    ha = n_heads * dim_attn
    qkv = jnp.dot(x_ref[...], w_ref[...], preferred_element_type=jnp.float32)
    _attend_and_store(qkv[:, :ha], qkv[:, ha:], x_ref.dtype, o_ref,
                      n_heads=n_heads, dim_attn=dim_attn, dim_val=dim_val,
                      seq_q=seq, seq_k=seq, approx_recip=approx_recip)


def _mha_cross_kernel(x_ref, kv_ref, wq_ref, wkv_ref, o_ref, *, n_heads,
                      dim_attn, dim_val, seq_q, seq_k, approx_recip):
    """Cross-attention: Q projection from x, fused K|V' projection from kv."""
    q_all = jnp.dot(x_ref[...], wq_ref[...], preferred_element_type=jnp.float32)
    kv_all = jnp.dot(kv_ref[...], wkv_ref[...], preferred_element_type=jnp.float32)
    _attend_and_store(q_all, kv_all, x_ref.dtype, o_ref,
                      n_heads=n_heads, dim_attn=dim_attn, dim_val=dim_val,
                      seq_q=seq_q, seq_k=seq_k, approx_recip=approx_recip)


def multi_head_attention_block(x, kv, wq, wk, wv, wfc, *,
                               compute_dtype=jnp.bfloat16,
                               num_batch_blocks=None,
                               approx_softmax_recip=None):
    """x: (B,S,D) f32; kv: (B,Sk,D) or None (self-attn); wq/wk: (H,A,D) torch
    Linear layout; wv: (H,D,D); wfc: (D, H*D).  Returns (B,S,D) f32.

    Note: on v5e prefer compute_dtype=jnp.float32 (no bf16 VPU path there)."""
    B, S, D = x.shape
    self_attn = (kv is None) or (kv is x)
    if kv is None:
        kv = x
    Sk = kv.shape[1]
    H, A, _ = wq.shape
    scale = 1.0 / math.sqrt(A)

    # --- wrapper-side weight preprocessing (f32) -------------------------------
    # Stack per-head weights so every contraction hits the last (lane) dim.
    wq_s = jnp.transpose(wq, (2, 0, 1)).reshape(D, H * A) * scale   # scale folded in
    wk_s = jnp.transpose(wk, (2, 0, 1)).reshape(D, H * A)
    # torch stack(dim=-1)+flatten => fc input feature j = d*H + h.
    # Wfc_h[d, o] = wfc[o, d*H + h];  fold fc into V:  Wvo_h = Wv_h^T @ Wfc_h.
    wfc_h = jnp.transpose(wfc.reshape(D, D, H), (2, 1, 0))           # (H, d_v, o)
    wvo = jnp.einsum('hiv,hvo->hio', jnp.transpose(wv, (0, 2, 1)), wfc_h)
    wvo_s = jnp.transpose(wvo, (1, 0, 2)).reshape(D, H * D)          # (D_in, H*D_out)

    cdt = compute_dtype
    approx = (cdt != jnp.float32) if approx_softmax_recip is None else approx_softmax_recip

    # --- batch blocking ---------------------------------------------------------
    if num_batch_blocks is None:
        # 2 "parallel" grid steps feed both v7x TensorCores; fall back to a single
        # step (best for single-TC v5e/v6e and tiny shapes) when splitting would
        # leave blocks whose row count is not 16-row (bf16 tile) aligned.
        rows_q, rows_k = (B // 2) * S, (B // 2) * Sk
        nb = 2 if (B % 2 == 0 and rows_q % 16 == 0 and rows_k % 16 == 0) else 1
    else:
        nb = num_batch_blocks
    assert B % nb == 0, "num_batch_blocks must divide the batch size"
    Bt = B // nb

    x2 = x.reshape(B * S, D).astype(cdt)          # flat row slab (no-op reshape)
    itemsize = jnp.dtype(cdt).itemsize

    flops_attn = 2 * B * H * S * Sk * (A + D)
    if self_attn:
        flops_proj = 2 * B * S * D * (2 * H * A + H * D)
        bytes_in = (B * S * D + D * (2 * H * A + H * D)) * itemsize
    else:
        flops_proj = 2 * B * S * D * (H * A) + 2 * B * Sk * D * (H * A + H * D)
        bytes_in = (B * S * D + B * Sk * D + D * H * A + D * (H * A + H * D)) * itemsize
    cost = pl.CostEstimate(flops=flops_proj + flops_attn,
                           transcendentals=B * H * S * Sk,
                           bytes_accessed=bytes_in + 4 * B * S * D)

    if self_attn:
        # one resident fused weight: [Wq*scale | Wk | Wvo]  -> (D, 2*H*A + H*D)
        w_all = jnp.concatenate([wq_s, wk_s, wvo_s], axis=1).astype(cdt)
        kernel = functools.partial(_mha_self_kernel, n_heads=H, dim_attn=A,
                                   dim_val=D, seq=S, approx_recip=approx)
        out2 = pl.pallas_call(
            kernel,
            out_shape=jax.ShapeDtypeStruct((B * S, D), jnp.float32),
            grid_spec=pltpu.PrefetchScalarGridSpec(
                num_scalar_prefetch=0,
                grid=(nb,),
                in_specs=[
                    pl.BlockSpec((Bt * S, D), lambda b: (b, 0)),            # x rows
                    pl.BlockSpec((D, 2 * H * A + H * D), lambda b: (0, 0)),  # W (resident)
                ],
                out_specs=pl.BlockSpec((Bt * S, D), lambda b: (b, 0)),
            ),
            compiler_params=pltpu.CompilerParams(
                dimension_semantics=("parallel",)),
            cost_estimate=cost,
        )(x2, w_all)
    else:
        kv2 = kv.reshape(B * Sk, D).astype(cdt)
        wq_c = wq_s.astype(cdt)
        wkv_c = jnp.concatenate([wk_s, wvo_s], axis=1).astype(cdt)   # [Wk | Wvo]
        kernel = functools.partial(_mha_cross_kernel, n_heads=H, dim_attn=A,
                                   dim_val=D, seq_q=S, seq_k=Sk,
                                   approx_recip=approx)
        out2 = pl.pallas_call(
            kernel,
            out_shape=jax.ShapeDtypeStruct((B * S, D), jnp.float32),
            grid_spec=pltpu.PrefetchScalarGridSpec(
                num_scalar_prefetch=0,
                grid=(nb,),
                in_specs=[
                    pl.BlockSpec((Bt * S, D), lambda b: (b, 0)),             # x rows
                    pl.BlockSpec((Bt * Sk, D), lambda b: (b, 0)),            # kv rows
                    pl.BlockSpec((D, H * A), lambda b: (0, 0)),              # Wq (resident)
                    pl.BlockSpec((D, H * A + H * D), lambda b: (0, 0)),      # Wk|Wvo (resident)
                ],
                out_specs=pl.BlockSpec((Bt * S, D), lambda b: (b, 0)),
            ),
            compiler_params=pltpu.CompilerParams(
                dimension_semantics=("parallel",)),
            cost_estimate=cost,
        )(x2, kv2, wq_c, wkv_c)

    return out2.reshape(B, S, D)


def _reference(x, kv, wq, wk, wv, wfc):
    """Pure-JAX reference mirroring the PyTorch module."""
    B, S, D = x.shape
    H, A, _ = wq.shape
    heads = []
    for h in range(H):
        q = x @ wq[h].T
        k = kv @ wk[h].T
        v = kv @ wv[h].T
        s = (q @ jnp.swapaxes(k, 2, 1)) / jnp.sqrt(jnp.float32(A))
        p = jax.nn.softmax(s, axis=-1)
        heads.append(p @ v)                        # (B, S, D)
    a = jnp.stack(heads, axis=-1)                  # (B, S, D, H)
    a = a.reshape(B, S, D * H)                     # flatten(start_dim=2)
    return a @ wfc.T


if __name__ == "__main__":
    B, S, D, A, H = 2, 8, 32, 16, 4   # batch, seq, dim_val, dim_attn, n_heads
    Sk = 16                           # kv seq length for the cross-attention test

    key = jax.random.PRNGKey(0)
    kx, kkv, kq, kk, kv_, kf = jax.random.split(key, 6)

    x = jax.random.normal(kx, (B, S, D), dtype=jnp.float32)
    kv_in = jax.random.normal(kkv, (B, Sk, D), dtype=jnp.float32)

    # deterministic synthetic weights (torch Linear layout: (out, in))
    def init(k, shape, fan_in):
        bound = 1.0 / math.sqrt(fan_in)
        return jax.random.uniform(k, shape, jnp.float32, -bound, bound)

    wq = init(kq, (H, A, D), D)
    wk = init(kk, (H, A, D), D)
    wv = init(kv_, (H, D, D), D)
    wfc = init(kf, (D, H * D), H * D)

    # --- self-attention (kv=None in the torch module) ---
    ref_self = _reference(x, x, wq, wk, wv, wfc)

    out_f32 = multi_head_attention_block(x, None, wq, wk, wv, wfc,
                                         compute_dtype=jnp.float32)
    out_f32 = jax.block_until_ready(out_f32)
    assert out_f32.shape == (B, S, D)
    assert jnp.allclose(out_f32, ref_self, atol=1e-2, rtol=1e-2), (
        float(jnp.max(jnp.abs(out_f32 - ref_self))))

    out_bf16 = multi_head_attention_block(x, None, wq, wk, wv, wfc,
                                          compute_dtype=jnp.bfloat16)
    out_bf16 = jax.block_until_ready(out_bf16)
    assert out_bf16.shape == (B, S, D)
    assert jnp.allclose(out_bf16, ref_self, atol=5e-2, rtol=5e-2), (
        float(jnp.max(jnp.abs(out_bf16 - ref_self))))

    # --- cross-attention (explicit kv) ---
    ref_cross = _reference(x, kv_in, wq, wk, wv, wfc)
    out_cross = multi_head_attention_block(x, kv_in, wq, wk, wv, wfc,
                                           compute_dtype=jnp.float32)
    out_cross = jax.block_until_ready(out_cross)
    assert out_cross.shape == (B, S, D)
    assert jnp.allclose(out_cross, ref_cross, atol=1e-2, rtol=1e-2), (
        float(jnp.max(jnp.abs(out_cross - ref_cross))))

    print("KERNEL_OK")
</pallas_src>

<mosaic_0001>
module attributes {stable_mosaic.version = 11 : i64} {
  func.func @_mha_self_kernel(%arg0: i32, %arg1: memref<16x32xf32, #tpu.memory_space<vmem>>, %arg2: memref<32x256xf32, #tpu.memory_space<vmem>>, %arg3: memref<16x32xf32, #tpu.memory_space<vmem>>) attributes {dimension_semantics = [#tpu.dimension_semantics<parallel>], iteration_bounds = array<i64: 1>, scalar_prefetch = 0 : i64, scratch_operands = 0 : i64, tpu.core_type = #tpu.core_type<tc>, window_params = [{transform_indices = @transform_0, window_bounds = array<i64: 16, 32>}, {pipeline_mode = #tpu.pipeline_mode<synchronous>, transform_indices = @transform_1, window_bounds = array<i64: 32, 256>}, {transform_indices = @transform_2, window_bounds = array<i64: 16, 32>}]} {
    %c0 = arith.constant 0 : index
    %c0_0 = arith.constant 0 : index
    %0 = vector.load %arg1[%c0, %c0_0] : memref<16x32xf32, #tpu.memory_space<vmem>>, vector<16x32xf32>
    %c0_1 = arith.constant 0 : index
    %c0_2 = arith.constant 0 : index
    %1 = vector.load %arg2[%c0_1, %c0_2] : memref<32x256xf32, #tpu.memory_space<vmem>>, vector<32x256xf32>
    %cst = arith.constant dense<0.000000e+00> : vector<16x256xf32>
    %2 = tpu.matmul %0, %1, %cst {dimension_numbers = #tpu.dot_dimension_numbers<[1], [0], [0], [1], [0, 0, 1, 1], [], []>} : vector<16x32xf32>, vector<32x256xf32>, vector<16x256xf32> -> vector<16x256xf32>
    %3 = vector.extract_strided_slice %2 {offsets = [0, 0], sizes = [16, 64], strides = [1, 1]} : vector<16x256xf32> to vector<16x64xf32>
    %4 = vector.extract_strided_slice %2 {offsets = [0, 64], sizes = [16, 192], strides = [1, 1]} : vector<16x256xf32> to vector<16x192xf32>
    %5 = vector.extract_strided_slice %3 {offsets = [0, 0], sizes = [8, 64], strides = [1, 1]} : vector<16x64xf32> to vector<8x64xf32>
    %6 = vector.extract_strided_slice %4 {offsets = [0, 0], sizes = [8, 64], strides = [1, 1]} : vector<16x192xf32> to vector<8x64xf32>
    %7 = vector.extract_strided_slice %4 {offsets = [0, 64], sizes = [8, 128], strides = [1, 1]} : vector<16x192xf32> to vector<8x128xf32>
    %cst_3 = arith.constant 0.000000e+00 : f32
    %8 = vector.broadcast %cst_3 : f32 to vector<8x32xf32>
    %9 = vector.extract_strided_slice %5 {offsets = [0, 0], sizes = [8, 16], strides = [1, 1]} : vector<8x64xf32> to vector<8x16xf32>
    %10 = vector.extract_strided_slice %6 {offsets = [0, 0], sizes = [8, 16], strides = [1, 1]} : vector<8x64xf32> to vector<8x16xf32>
    %11 = vector.extract_strided_slice %7 {offsets = [0, 0], sizes = [8, 32], strides = [1, 1]} : vector<8x128xf32> to vector<8x32xf32>
    %cst_4 = arith.constant dense<0.000000e+00> : vector<8x8xf32>
    %12 = tpu.matmul %9, %10, %cst_4 {dimension_numbers = #tpu.dot_dimension_numbers<[1], [1], [0], [0], [0, 0, 1, 0], [], []>} : vector<8x16xf32>, vector<8x16xf32>, vector<8x8xf32> -> vector<8x8xf32>
    %cst_5 = arith.constant dense<0xFF800000> : vector<8xf32>
    %13 = vector.multi_reduction <maximumf>, %12, %cst_5 [1] : vector<8x8xf32> to vector<8xf32>
    %14 = vector.shape_cast %13 : vector<8xf32> to vector<8x1xf32>
    %15 = vector.broadcast %14 : vector<8x1xf32> to vector<8x8xf32>
    %16 = arith.subf %12, %15 : vector<8x8xf32>
    %17 = math.exp %16 : vector<8x8xf32>
    %cst_6 = arith.constant dense<0.000000e+00> : vector<8xf32>
    %18 = vector.multi_reduction <add>, %17, %cst_6 [1] : vector<8x8xf32> to vector<8xf32>
    %19 = vector.shape_cast %18 : vector<8xf32> to vector<8x1xf32>
    %20 = tpu.reciprocal %19 : vector<8x1xf32> -> vector<8x1xf32>
    %21 = vector.broadcast %20 : vector<8x1xf32> to vector<8x8xf32>
    %22 = arith.mulf %17, %21 : vector<8x8xf32>
    %cst_7 = arith.constant dense<0.000000e+00> : vector<8x32xf32>
    %23 = tpu.matmul %22, %11, %cst_7 {dimension_numbers = #tpu.dot_dimension_numbers<[1], [0], [0], [1], [0, 0, 1, 1], [], []>} : vector<8x8xf32>, vector<8x32xf32>, vector<8x32xf32> -> vector<8x32xf32>
    %24 = arith.addf %8, %23 : vector<8x32xf32>
    %25 = vector.extract_strided_slice %5 {offsets = [0, 16], sizes = [8, 16], strides = [1, 1]} : vector<8x64xf32> to vector<8x16xf32>
    %26 = vector.extract_strided_slice %6 {offsets = [0, 16], sizes = [8, 16], strides = [1, 1]} : vector<8x64xf32> to vector<8x16xf32>
    %27 = vector.extract_strided_slice %7 {offsets = [0, 32], sizes = [8, 32], strides = [1, 1]} : vector<8x128xf32> to vector<8x32xf32>
    %cst_8 = arith.constant dense<0.000000e+00> : vector<8x8xf32>
    %28 = tpu.matmul %25, %26, %cst_8 {dimension_numbers = #tpu.dot_dimension_numbers<[1], [1], [0], [0], [0, 0, 1, 0], [], []>} : vector<8x16xf32>, vector<8x16xf32>, vector<8x8xf32> -> vector<8x8xf32>
    %cst_9 = arith.constant dense<0xFF800000> : vector<8xf32>
    %29 = vector.multi_reduction <maximumf>, %28, %cst_9 [1] : vector<8x8xf32> to vector<8xf32>
    %30 = vector.shape_cast %29 : vector<8xf32> to vector<8x1xf32>
    %31 = vector.broadcast %30 : vector<8x1xf32> to vector<8x8xf32>
    %32 = arith.subf %28, %31 : vector<8x8xf32>
    %33 = math.exp %32 : vector<8x8xf32>
    %cst_10 = arith.constant dense<0.000000e+00> : vector<8xf32>
    %34 = vector.multi_reduction <add>, %33, %cst_10 [1] : vector<8x8xf32> to vector<8xf32>
    %35 = vector.shape_cast %34 : vector<8xf32> to vector<8x1xf32>
    %36 = tpu.reciprocal %35 : vector<8x1xf32> -> vector<8x1xf32>
    %37 = vector.broadcast %36 : vector<8x1xf32> to vector<8x8xf32>
    %38 = arith.mulf %33, %37 : vector<8x8xf32>
    %cst_11 = arith.constant dense<0.000000e+00> : vector<8x32xf32>
    %39 = tpu.matmul %38, %27, %cst_11 {dimension_numbers = #tpu.dot_dimension_numbers<[1], [0], [0], [1], [0, 0, 1, 1], [], []>} : vector<8x8xf32>, vector<8x32xf32>, vector<8x32xf32> -> vector<8x32xf32>
    %40 = arith.addf %24, %39 : vector<8x32xf32>
    %41 = vector.extract_strided_slice %5 {offsets = [0, 32], sizes = [8, 16], strides = [1, 1]} : vector<8x64xf32> to vector<8x16xf32>
    %42 = vector.extract_strided_slice %6 {offsets = [0, 32], sizes = [8, 16], strides = [1, 1]} : vector<8x64xf32> to vector<8x16xf32>
    %43 = vector.extract_strided_slice %7 {offsets = [0, 64], sizes = [8, 32], strides = [1, 1]} : vector<8x128xf32> to vector<8x32xf32>
    %cst_12 = arith.constant dense<0.000000e+00> : vector<8x8xf32>
    %44 = tpu.matmul %41, %42, %cst_12 {dimension_numbers = #tpu.dot_dimension_numbers<[1], [1], [0], [0], [0, 0, 1, 0], [], []>} : vector<8x16xf32>, vector<8x16xf32>, vector<8x8xf32> -> vector<8x8xf32>
    %cst_13 = arith.constant dense<0xFF800000> : vector<8xf32>
    %45 = vector.multi_reduction <maximumf>, %44, %cst_13 [1] : vector<8x8xf32> to vector<8xf32>
    %46 = vector.shape_cast %45 : vector<8xf32> to vector<8x1xf32>
    %47 = vector.broadcast %46 : vector<8x1xf32> to vector<8x8xf32>
    %48 = arith.subf %44, %47 : vector<8x8xf32>
    %49 = math.exp %48 : vector<8x8xf32>
    %cst_14 = arith.constant dense<0.000000e+00> : vector<8xf32>
    %50 = vector.multi_reduction <add>, %49, %cst_14 [1] : vector<8x8xf32> to vector<8xf32>
    %51 = vector.shape_cast %50 : vector<8xf32> to vector<8x1xf32>
    %52 = tpu.reciprocal %51 : vector<8x1xf32> -> vector<8x1xf32>
    %53 = vector.broadcast %52 : vector<8x1xf32> to vector<8x8xf32>
    %54 = arith.mulf %49, %53 : vector<8x8xf32>
    %cst_15 = arith.constant dense<0.000000e+00> : vector<8x32xf32>
    %55 = tpu.matmul %54, %43, %cst_15 {dimension_numbers = #tpu.dot_dimension_numbers<[1], [0], [0], [1], [0, 0, 1, 1], [], []>} : vector<8x8xf32>, vector<8x32xf32>, vector<8x32xf32> -> vector<8x32xf32>
    %56 = arith.addf %40, %55 : vector<8x32xf32>
    %57 = vector.extract_strided_slice %5 {offsets = [0, 48], sizes = [8, 16], strides = [1, 1]} : vector<8x64xf32> to vector<8x16xf32>
    %58 = vector.extract_strided_slice %6 {offsets = [0, 48], sizes = [8, 16], strides = [1, 1]} : vector<8x64xf32> to vector<8x16xf32>
    %59 = vector.extract_strided_slice %7 {offsets = [0, 96], sizes = [8, 32], strides = [1, 1]} : vector<8x128xf32> to vector<8x32xf32>
    %cst_16 = arith.constant dense<0.000000e+00> : vector<8x8xf32>
    %60 = tpu.matmul %57, %58, %cst_16 {dimension_numbers = #tpu.dot_dimension_numbers<[1], [1], [0], [0], [0, 0, 1, 0], [], []>} : vector<8x16xf32>, vector<8x16xf32>, vector<8x8xf32> -> vector<8x8xf32>
    %cst_17 = arith.constant dense<0xFF800000> : vector<8xf32>
    %61 = vector.multi_reduction <maximumf>, %60, %cst_17 [1] : vector<8x8xf32> to vector<8xf32>
    %62 = vector.shape_cast %61 : vector<8xf32> to vector<8x1xf32>
    %63 = vector.broadcast %62 : vector<8x1xf32> to vector<8x8xf32>
    %64 = arith.subf %60, %63 : vector<8x8xf32>
    %65 = math.exp %64 : vector<8x8xf32>
    %cst_18 = arith.constant dense<0.000000e+00> : vector<8xf32>
    %66 = vector.multi_reduction <add>, %65, %cst_18 [1] : vector<8x8xf32> to vector<8xf32>
    %67 = vector.shape_cast %66 : vector<8xf32> to vector<8x1xf32>
    %68 = tpu.reciprocal %67 : vector<8x1xf32> -> vector<8x1xf32>
    %69 = vector.broadcast %68 : vector<8x1xf32> to vector<8x8xf32>
    %70 = arith.mulf %65, %69 : vector<8x8xf32>
    %cst_19 = arith.constant dense<0.000000e+00> : vector<8x32xf32>
    %71 = tpu.matmul %70, %59, %cst_19 {dimension_numbers = #tpu.dot_dimension_numbers<[1], [0], [0], [1], [0, 0, 1, 1], [], []>} : vector<8x8xf32>, vector<8x32xf32>, vector<8x32xf32> -> vector<8x32xf32>
    %72 = arith.addf %56, %71 : vector<8x32xf32>
    %c0_20 = arith.constant 0 : index
    %c0_21 = arith.constant 0 : index
    %73 = vector.load %arg3[%c0_20, %c0_21] : memref<16x32xf32, #tpu.memory_space<vmem>>, vector<8x32xf32>
    tpu.vector_store %arg3[%c0_20, %c0_21], %72 {strides = array<i32>} : memref<16x32xf32, #tpu.memory_space<vmem>>, vector<8x32xf32>,
    %74 = vector.extract_strided_slice %3 {offsets = [8, 0], sizes = [8, 64], strides = [1, 1]} : vector<16x64xf32> to vector<8x64xf32>
    %75 = vector.extract_strided_slice %4 {offsets = [8, 0], sizes = [8, 64], strides = [1, 1]} : vector<16x192xf32> to vector<8x64xf32>
    %76 = vector.extract_strided_slice %4 {offsets = [8, 64], sizes = [8, 128], strides = [1, 1]} : vector<16x192xf32> to vector<8x128xf32>
    %cst_22 = arith.constant 0.000000e+00 : f32
    %77 = vector.broadcast %cst_22 : f32 to vector<8x32xf32>
    %78 = vector.extract_strided_slice %74 {offsets = [0, 0], sizes = [8, 16], strides = [1, 1]} : vector<8x64xf32> to vector<8x16xf32>
    %79 = vector.extract_strided_slice %75 {offsets = [0, 0], sizes = [8, 16], strides = [1, 1]} : vector<8x64xf32> to vector<8x16xf32>
    %80 = vector.extract_strided_slice %76 {offsets = [0, 0], sizes = [8, 32], strides = [1, 1]} : vector<8x128xf32> to vector<8x32xf32>
    %cst_23 = arith.constant dense<0.000000e+00> : vector<8x8xf32>
    %81 = tpu.matmul %78, %79, %cst_23 {dimension_numbers = #tpu.dot_dimension_numbers<[1], [1], [0], [0], [0, 0, 1, 0], [], []>} : vector<8x16xf32>, vector<8x16xf32>, vector<8x8xf32> -> vector<8x8xf32>
    %cst_24 = arith.constant dense<0xFF800000> : vector<8xf32>
    %82 = vector.multi_reduction <maximumf>, %81, %cst_24 [1] : vector<8x8xf32> to vector<8xf32>
    %83 = vector.shape_cast %82 : vector<8xf32> to vector<8x1xf32>
    %84 = vector.broadcast %83 : vector<8x1xf32> to vector<8x8xf32>
    %85 = arith.subf %81, %84 : vector<8x8xf32>
    %86 = math.exp %85 : vector<8x8xf32>
    %cst_25 = arith.constant dense<0.000000e+00> : vector<8xf32>
    %87 = vector.multi_reduction <add>, %86, %cst_25 [1] : vector<8x8xf32> to vector<8xf32>
    %88 = vector.shape_cast %87 : vector<8xf32> to vector<8x1xf32>
    %89 = tpu.reciprocal %88 : vector<8x1xf32> -> vector<8x1xf32>
    %90 = vector.broadcast %89 : vector<8x1xf32> to vector<8x8xf32>
    %91 = arith.mulf %86, %90 : vector<8x8xf32>
    %cst_26 = arith.constant dense<0.000000e+00> : vector<8x32xf32>
    %92 = tpu.matmul %91, %80, %cst_26 {dimension_numbers = #tpu.dot_dimension_numbers<[1], [0], [0], [1], [0, 0, 1, 1], [], []>} : vector<8x8xf32>, vector<8x32xf32>, vector<8x32xf32> -> vector<8x32xf32>
    %93 = arith.addf %77, %92 : vector<8x32xf32>
    %94 = vector.extract_strided_slice %74 {offsets = [0, 16], sizes = [8, 16], strides = [1, 1]} : vector<8x64xf32> to vector<8x16xf32>
    %95 = vector.extract_strided_slice %75 {offsets = [0, 16], sizes = [8, 16], strides = [1, 1]} : vector<8x64xf32> to vector<8x16xf32>
    %96 = vector.extract_strided_slice %76 {offsets = [0, 32], sizes = [8, 32], strides = [1, 1]} : vector<8x128xf32> to vector<8x32xf32>
    %cst_27 = arith.constant dense<0.000000e+00> : vector<8x8xf32>
    %97 = tpu.matmul %94, %95, %cst_27 {dimension_numbers = #tpu.dot_dimension_numbers<[1], [1], [0], [0], [0, 0, 1, 0], [], []>} : vector<8x16xf32>, vector<8x16xf32>, vector<8x8xf32> -> vector<8x8xf32>
    %cst_28 = arith.constant dense<0xFF800000> : vector<8xf32>
    %98 = vector.multi_reduction <maximumf>, %97, %cst_28 [1] : vector<8x8xf32> to vector<8xf32>
    %99 = vector.shape_cast %98 : vector<8xf32> to vector<8x1xf32>
    %100 = vector.broadcast %99 : vector<8x1xf32> to vector<8x8xf32>
    %101 = arith.subf %97, %100 : vector<8x8xf32>
    %102 = math.exp %101 : vector<8x8xf32>
    %cst_29 = arith.constant dense<0.000000e+00> : vector<8xf32>
    %103 = vector.multi_reduction <add>, %102, %cst_29 [1] : vector<8x8xf32> to vector<8xf32>
    %104 = vector.shape_cast %103 : vector<8xf32> to vector<8x1xf32>
    %105 = tpu.reciprocal %104 : vector<8x1xf32> -> vector<8x1xf32>
    %106 = vector.broadcast %105 : vector<8x1xf32> to vector<8x8xf32>
    %107 = arith.mulf %102, %106 : vector<8x8xf32>
    %cst_30 = arith.constant dense<0.000000e+00> : vector<8x32xf32>
    %108 = tpu.matmul %107, %96, %cst_30 {dimension_numbers = #tpu.dot_dimension_numbers<[1], [0], [0], [1], [0, 0, 1, 1], [], []>} : vector<8x8xf32>, vector<8x32xf32>, vector<8x32xf32> -> vector<8x32xf32>
    %109 = arith.addf %93, %108 : vector<8x32xf32>
    %110 = vector.extract_strided_slice %74 {offsets = [0, 32], sizes = [8, 16], strides = [1, 1]} : vector<8x64xf32> to vector<8x16xf32>
    %111 = vector.extract_strided_slice %75 {offsets = [0, 32], sizes = [8, 16], strides = [1, 1]} : vector<8x64xf32> to vector<8x16xf32>
    %112 = vector.extract_strided_slice %76 {offsets = [0, 64], sizes = [8, 32], strides = [1, 1]} : vector<8x128xf32> to vector<8x32xf32>
    %cst_31 = arith.constant dense<0.000000e+00> : vector<8x8xf32>
    %113 = tpu.matmul %110, %111, %cst_31 {dimension_numbers = #tpu.dot_dimension_numbers<[1], [1], [0], [0], [0, 0, 1, 0], [], []>} : vector<8x16xf32>, vector<8x16xf32>, vector<8x8xf32> -> vector<8x8xf32>
    %cst_32 = arith.constant dense<0xFF800000> : vector<8xf32>
    %114 = vector.multi_reduction <maximumf>, %113, %cst_32 [1] : vector<8x8xf32> to vector<8xf32>
    %115 = vector.shape_cast %114 : vector<8xf32> to vector<8x1xf32>
    %116 = vector.broadcast %115 : vector<8x1xf32> to vector<8x8xf32>
    %117 = arith.subf %113, %116 : vector<8x8xf32>
    %118 = math.exp %117 : vector<8x8xf32>
    %cst_33 = arith.constant dense<0.000000e+00> : vector<8xf32>
    %119 = vector.multi_reduction <add>, %118, %cst_33 [1] : vector<8x8xf32> to vector<8xf32>
    %120 = vector.shape_cast %119 : vector<8xf32> to vector<8x1xf32>
    %121 = tpu.reciprocal %120 : vector<8x1xf32> -> vector<8x1xf32>
    %122 = vector.broadcast %121 : vector<8x1xf32> to vector<8x8xf32>
    %123 = arith.mulf %118, %122 : vector<8x8xf32>
    %cst_34 = arith.constant dense<0.000000e+00> : vector<8x32xf32>
    %124 = tpu.matmul %123, %112, %cst_34 {dimension_numbers = #tpu.dot_dimension_numbers<[1], [0], [0], [1], [0, 0, 1, 1], [], []>} : vector<8x8xf32>, vector<8x32xf32>, vector<8x32xf32> -> vector<8x32xf32>
    %125 = arith.addf %109, %124 : vector<8x32xf32>
    %126 = vector.extract_strided_slice %74 {offsets = [0, 48], sizes = [8, 16], strides = [1, 1]} : vector<8x64xf32> to vector<8x16xf32>
    %127 = vector.extract_strided_slice %75 {offsets = [0, 48], sizes = [8, 16], strides = [1, 1]} : vector<8x64xf32> to vector<8x16xf32>
    %128 = vector.extract_strided_slice %76 {offsets = [0, 96], sizes = [8, 32], strides = [1, 1]} : vector<8x128xf32> to vector<8x32xf32>
    %cst_35 = arith.constant dense<0.000000e+00> : vector<8x8xf32>
    %129 = tpu.matmul %126, %127, %cst_35 {dimension_numbers = #tpu.dot_dimension_numbers<[1], [1], [0], [0], [0, 0, 1, 0], [], []>} : vector<8x16xf32>, vector<8x16xf32>, vector<8x8xf32> -> vector<8x8xf32>
    %cst_36 = arith.constant dense<0xFF800000> : vector<8xf32>
    %130 = vector.multi_reduction <maximumf>, %129, %cst_36 [1] : vector<8x8xf32> to vector<8xf32>
    %131 = vector.shape_cast %130 : vector<8xf32> to vector<8x1xf32>
    %132 = vector.broadcast %131 : vector<8x1xf32> to vector<8x8xf32>
    %133 = arith.subf %129, %132 : vector<8x8xf32>
    %134 = math.exp %133 : vector<8x8xf32>
    %cst_37 = arith.constant dense<0.000000e+00> : vector<8xf32>
    %135 = vector.multi_reduction <add>, %134, %cst_37 [1] : vector<8x8xf32> to vector<8xf32>
    %136 = vector.shape_cast %135 : vector<8xf32> to vector<8x1xf32>
    %137 = tpu.reciprocal %136 : vector<8x1xf32> -> vector<8x1xf32>
    %138 = vector.broadcast %137 : vector<8x1xf32> to vector<8x8xf32>
    %139 = arith.mulf %134, %138 : vector<8x8xf32>
    %cst_38 = arith.constant dense<0.000000e+00> : vector<8x32xf32>
    %140 = tpu.matmul %139, %128, %cst_38 {dimension_numbers = #tpu.dot_dimension_numbers<[1], [0], [0], [1], [0, 0, 1, 1], [], []>} : vector<8x8xf32>, vector<8x32xf32>, vector<8x32xf32> -> vector<8x32xf32>
    %141 = arith.addf %125, %140 : vector<8x32xf32>
    %c8 = arith.constant 8 : index
    %c0_39 = arith.constant 0 : index
    %142 = vector.load %arg3[%c8, %c0_39] : memref<16x32xf32, #tpu.memory_space<vmem>>, vector<8x32xf32>
    tpu.vector_store %arg3[%c8, %c0_39], %141 {strides = array<i32>} : memref<16x32xf32, #tpu.memory_space<vmem>>, vector<8x32xf32>,
    return
  }
  func.func @transform_0(%arg0: i32) -> (i32, i32) {
    %c0_i32 = arith.constant 0 : i32
    %c0_i32_0 = arith.constant 0 : i32
    return %arg0, %c0_i32 : i32, i32
  }
  func.func @transform_1(%arg0: i32) -> (i32, i32) {
    %c0_i32 = arith.constant 0 : i32
    %c0_i32_0 = arith.constant 0 : i32
    %c0_i32_1 = arith.constant 0 : i32
    return %c0_i32, %c0_i32_0 : i32, i32
  }
  func.func @transform_2(%arg0: i32) -> (i32, i32) {
    %c0_i32 = arith.constant 0 : i32
    %c0_i32_0 = arith.constant 0 : i32
    return %arg0, %c0_i32 : i32, i32
  }
}

</mosaic_0001>

<bundles_post_ra>
// kernel: tpu_custom_call.1
= control target key start
LH: loop header
LB: loop body
LE: loop exit
PB: predicated region body
PF: predicated region fallthrough
CT: control target
= control target key end

     0   :  { %7 = vsyncpa [#allocation3], 0  ;;  %s1964_s0 = inlined_call_operand.hbm [shape: f32[16,32], index: 0, kind: input, shape index: {}]   ;;  %s1965_s1 = inlined_call_operand.hbm [shape: f32[32,256], index: 1, kind: input, shape index: {}]   ;;  %s1966_s2 = inlined_call_operand.hbm [shape: f32[16,32], index: 2, kind: output, shape index: {}]  }
   0x1   :  { %8 = vsyncpa [#allocation6], 0 }
   0x2   :  { %9 = vsyncpa [#allocation4], 0  ;;  %s1751_s9 = smov [#allocation2]   ;;  %s1679_s13 = scalar_lea.hbm %s1964_s0, 256 }
   0x3   :  { %s15_s10 = sshll.u32 %s1751_s9, 4  ;;  %p1680_p0 = scmp.ne.s32.totalorder %s1964_s0, %s1679_s13  ;;  %s16_s10 = int_to_ptr.vmem [resolvable:$true] %s15_s10 }
   0x4   :  { %p1683_p1 = scmp.lt.u32.totalorder %s1679_s13, %s1964_s0 }
   0x6   :  { %p1685_p2 = pnand %p1683_p1, %p1680_p0 }
   0x8   :  { %1688 = shalt.err (!%p1685_p2)
}
   0x9   :  { %s1689_s18 = scalar_lea.vmem %s16_s10, 256  ;;  %p1694_p4 = scmp.lt.s32.totalorder %s16_s10, %s16_s10 }
   0xa   :  { %p1690_p3 = scmp.ne.s32.totalorder %s16_s10, %s1689_s18  ;;  %p1695_p5 = scmp.lt.s32.totalorder %s1689_s18, %s1689_s18 }
   0xc   :  { %p1696_p6 = por %p1695_p5, %p1694_p4 }
   0xe   :  { %p1697_p7 = pnand %p1696_p6, %p1690_p3 }
  0x10   :  { %1700 = shalt.err (!%p1697_p7)
}
  0x11   :  { %s1752_s19 = smov 128   ;;  %s1753_s20 = smov 8  }
  0x12   :  { %21 = dma.hbm_to_vmem [thread:$0]  %s1964_s0, 256, %s16_s10, [#allocation3], %s1752_s19, %s1752_s19, %s1753_s20  }
  0x13   :  { %s1754_s23 = smov [#allocation5]   ;;  %s1701_s27 = scalar_lea.hbm %s1965_s1, 1024 }
  0x14   :  { %s27_s24 = sshll.u32 %s1754_s23, 4  ;;  %p1702_p8 = scmp.ne.s32.totalorder %s1965_s1, %s1701_s27  ;;  %s28_s24 = int_to_ptr.vmem [resolvable:$true] %s27_s24 }
  0x15   :  { %p1705_p9 = scmp.lt.u32.totalorder %s1701_s27, %s1965_s1 }
  0x17   :  { %p1707_p10 = pnand %p1705_p9, %p1702_p8 }
  0x19   :  { %1710 = shalt.err (!%p1707_p10)
}
  0x1a   :  { %s1711_s4 = scalar_lea.vmem %s28_s24, 1024  ;;  %p1716_p12 = scmp.lt.s32.totalorder %s28_s24, %s28_s24 }
  0x1b   :  { %p1712_p11 = scmp.ne.s32.totalorder %s28_s24, %s1711_s4  ;;  %p1717_p13 = scmp.lt.s32.totalorder %s1711_s4, %s1711_s4 }
  0x1d   :  { %p1718_p0 = por %p1717_p13, %p1716_p12 }
  0x1f   :  { %p1719_p1 = pnand %p1718_p0, %p1712_p11 }
  0x21   :  { %1722 = shalt.err (!%p1719_p1)
}
  0x22   :  { %s1755_s0 = smov 256   ;;  %s1756_s5 = smov 16  }
  0x23   :  { %33 = dma.hbm_to_vmem [thread:$0]  %s1965_s1, 1024, %s28_s24, [#allocation6], %s1755_s0, %s1755_s0, %s1756_s5  }
  0x24   :  { %1745 = dma.done.wait [#allocation3], 256  }
  0x25   :  { %1746 = vsyncadd [#allocation3], 4294967040 }
  0x26   :  { %1747 = dma.done.wait [#allocation6], 1024  }
  0x27   :  { %1748 = vsyncadd [#allocation6], 4294966272  ;;  %v1757_v0 = vmov 0.0   ;;  %v43_v1 = vld [vmem:[#allocation5 + $0x8] sm:$0xff]  ;;  %v45_v2 = vld [vmem:[#allocation5 + $0x18] sm:$0xff]  ;;  %vm50_vm0 = vcmask 261120  }
  0x28   :  { %121 = vmatprep.mubr.f32.mxu0 %v1757_v0  ;;  %1532 = vmatprep.subr.mxu1 %v1757_v0  ;;  %v42_v3 = vld [vmem:[#allocation5] sm:$0xff]  ;;  %v1612_v4 = vpack.c.bf16 %v45_v2, %v43_v1  ;;  %v44_v5 = vld [vmem:[#allocation5 + $0x10] sm:$0xff]  ;;  %v47_v6 = vld [vmem:[#allocation5 + $0x28] sm:$0xff]  ;;  %vm1758_vm1 = vmmov 0   ;;  %s1759_s1 = smov 112   ;;  %s1760_s8 = smov 64  }
  0x29   :  { %v49_v7 = vld [vmem:[#allocation5 + $0x38] sm:$0xff]  ;;  %v1614_v8 = vpack.c.bf16 %v44_v5, %v42_v3  ;;  %v46_v10 = vld [vmem:[#allocation5 + $0x20] sm:$0xff]  ;;  %v48_v11 = vld [vmem:[#allocation5 + $0x30] sm:$0xff]  ;;  %1534 = vmatprep.mubr.msk.f32.mxu1 %vm1758_vm1, %v1757_v0  ;;  %s1761_s9 = smov 32   ;;  %s1762_s10 = smov 48   ;;  %vm137_vm2 = vcmask 130048  }
  0x2a   :  { %v1616_v9 = vpack.c.bf16 %v49_v7, %v47_v6  ;;  %1613 = vmatprep.subr.bf16.mxu0 %v1612_v4  ;;  %v1618_v12 = vpack.c.bf16 %v48_v11, %v46_v10  ;;  %v40_v13 = vld [vmem:[#allocation2] sm:$0xff]  ;;  %v41_v14 = vld [vmem:[#allocation2 + $0x8] sm:$0xff]  ;;  %s1763_s11 = smov 96   ;;  %s1764_s12 = smov 80   ;;  %vm212_vm3 = vcmask 64512  }
  0x2b   :  { %1615 = vmatpush1.bf16.msra.mxu0 %v1614_v8  ;;  %s1765_s13 = smov [#allocation7]  }
  0x2c   :  { %1617 = vmatprep.subr.bf16.mxu0 %v1616_v9  ;;  %s1461_s14 = sshll.u32 %s1765_s13, 4  ;;  %s1462_s14 = int_to_ptr.vmem [resolvable:$true] %s1461_s14 }
  0x2d   :  { %s1723_s15 = scalar_lea.vmem %s1462_s14, 256  ;;  %p1728_p3 = scmp.lt.s32.totalorder %s1462_s14, %s1462_s14 }
  0x2e   :  { %p1724_p2 = scmp.ne.s32.totalorder %s1462_s14, %s1723_s15  ;;  %p1729_p4 = scmp.lt.s32.totalorder %s1723_s15, %s1723_s15 }
  0x2f   :  { %1619 = vmatpush1.bf16.msra.mxu0 %v1618_v12 }
  0x30   :  { %1552 = vmatprep.subr.mxu0 %v1757_v0  ;;  %p1730_p5 = por %p1729_p4, %p1728_p3 }
  0x32   :  { %1474 = vmatmul.mubr.msk.f32.vlgmr.msra.gmra.mrb[0].mxu0 %vm50_vm0, %v40_v13  ;;  %p1731_p6 = pnand %p1730_p5, %p1724_p2 }
  0x33   :  { %127 = vmatprep.mubr.f32.mxu0 %v1757_v0 }
  0x36   :  { %1475 = vmatmul.mubr.msk.f32.gmra.mrb[2].mxu0 %vm50_vm0, %v41_v14 }
  0x37   :  { %1554 = vmatprep.mubr.msk.f32.mxu0 %vm1758_vm1, %v1757_v0 }
 0x105   :  { %v123_v15 = vpop.f32.mrb[0].mxu0 }
 0x106   :  { %224 = vrot.lane.b32.xlu1 %v123_v15, %s1759_s1  ;;  %135 = vrot.lane.b32.xlu0 %v123_v15, %s1760_s8  ;;  %v1820_v16 = vpop.f32.mrb[1].mxu0 }
 0x109   :  { %v129_v17 = vpop.f32.mrb[2].mxu0 }
 0x10a   :  { %465 = vrot.lane.b32.xlu1 %v123_v15, %s1761_s9  ;;  %226 = vrot.lane.b32.xlu0 %v123_v15, %s1762_s10  ;;  %v1823_v18 = vpop.f32.mrb[3].mxu0 }
 0x10e   :  { %631 = vrot.lane.b32.xlu1 %v123_v15, %s1756_s5  ;;  %463 = vrot.lane.b32.xlu0 %v123_v15, %s1763_s11 }
 0x112   :  { %629 = vrot.lane.b32.xlu0 %v123_v15, %s1764_s12  ;;  %797 = vrot.lane.b32.xlu1 %v129_v17, %s1760_s8 }
 0x116   :  { %886 = vrot.lane.b32.xlu0 %v129_v17, %s1762_s10  ;;  %884 = vrot.lane.b32.xlu1 %v129_v17, %s1759_s1 }
 0x11a   :  { %1125 = vrot.lane.b32.xlu0 %v129_v17, %s1761_s9  ;;  %1123 = vrot.lane.b32.xlu1 %v129_v17, %s1763_s11 }
 0x11e   :  { %1291 = vrot.lane.b32.xlu0 %v129_v17, %s1756_s5  ;;  %1289 = vrot.lane.b32.xlu1 %v129_v17, %s1764_s12 }
 0x178   :  { %v225_v19 = vpop.permute.xlu1 %224  ;;  %v136_v20 = vpop.permute.xlu0 %135 }
 0x179   :  { %1533 = vmatpush3.xpose.msk.msra.mxu1 %vm137_vm2, %v136_v20 }
 0x17a   :  { %1537 = vmatprep.subr.mxu1 %v1757_v0 }
 0x17c   :  { %v466_v21 = vpop.permute.xlu1 %465  ;;  %1535 = vmatmul.mubr.msk.f32.vlgmr.msra.gmra.mrb[0].mxu1 %vm137_vm2, %v123_v15  ;;  %v227_v22 = vpop.permute.xlu0 %226 }
 0x17d   :  { %1538 = vmatpush3.xpose.msk.msra.mxu1 %vm137_vm2, %v227_v22  ;;  %1553 = vmatpush3.xpose.msk.msra.mxu0 %vm137_vm2, %v466_v21 }
 0x17e   :  { %1539 = vmatprep.mubr.msk.f32.mxu1 %vm1758_vm1, %v1757_v0  ;;  %1562 = vmatprep.subr.mxu0 %v1757_v0 }
 0x17f   :  { %1542 = vmatprep.subr.mxu1 %v1757_v0 }
 0x180   :  { %v632_v23 = vpop.permute.xlu1 %631  ;;  %1540 = vmatmul.mubr.msk.f32.vlgmr.msra.gmra.mrb[2].mxu1 %vm137_vm2, %v225_v19  ;;  %v464_v24 = vpop.permute.xlu0 %463 }
 0x181   :  { %1555 = vmatmul.mubr.msk.f32.vlgmr.msra.gmra.mrb[4].mxu0 %vm137_vm2, %v464_v24  ;;  %1544 = vmatprep.mubr.msk.f32.mxu1 %vm1758_vm1, %v1757_v0 }
 0x182   :  { %1563 = vmatpush3.xpose.msk.msra.mxu0 %vm137_vm2, %v632_v23  ;;  %1564 = vmatprep.mubr.msk.f32.mxu0 %vm1758_vm1, %v1757_v0 }
 0x183   :  { %1572 = vmatprep.subr.mxu0 %v1757_v0 }
 0x184   :  { %v630_v25 = vpop.permute.xlu0 %629  ;;  %v798_v26 = vpop.permute.xlu1 %797 }
 0x185   :  { %1565 = vmatmul.mubr.msk.f32.vlgmr.msra.gmra.mrb[6].mxu0 %vm137_vm2, %v630_v25 }
 0x186   :  { %1573 = vmatpush3.xpose.msk.msra.mxu0 %vm137_vm2, %v798_v26  ;;  %1574 = vmatprep.mubr.msk.f32.mxu0 %vm1758_vm1, %v1757_v0 }
 0x187   :  { %1577 = vmatprep.subr.mxu0 %v1757_v0 }
 0x188   :  { %v887_v27 = vpop.permute.xlu0 %886  ;;  %v885_v28 = vpop.permute.xlu1 %884 }
 0x189   :  { %1575 = vmatmul.mubr.msk.f32.vlgmr.msra.gmra.mrb[8].mxu0 %vm137_vm2, %v129_v17 }
 0x18a   :  { %1578 = vmatpush3.xpose.msk.msra.mxu0 %vm137_vm2, %v887_v27  ;;  %1579 = vmatprep.mubr.msk.f32.mxu0 %vm1758_vm1, %v1757_v0 }
 0x18b   :  { %1592 = vmatprep.subr.mxu0 %v1757_v0 }
 0x18c   :  { %v1126_v29 = vpop.permute.xlu0 %1125  ;;  %v1124_v30 = vpop.permute.xlu1 %1123 }
 0x18d   :  { %1580 = vmatmul.mubr.msk.f32.vlgmr.msra.gmra.mrb[10].mxu0 %vm137_vm2, %v885_v28 }
 0x18e   :  { %1593 = vmatpush3.xpose.msk.msra.mxu0 %vm137_vm2, %v1126_v29  ;;  %1594 = vmatprep.mubr.msk.f32.mxu0 %vm1758_vm1, %v1757_v0 }
 0x18f   :  { %1602 = vmatprep.subr.mxu0 %v1757_v0 }
 0x190   :  { %v1292_v31 = vpop.permute.xlu0 %1291  ;;  %v1290_v32 = vpop.permute.xlu1 %1289 }
 0x191   :  { %1595 = vmatmul.mubr.msk.f32.vlgmr.msra.gmra.mrb[12].mxu0 %vm137_vm2, %v1124_v30 }
 0x192   :  { %1603 = vmatpush3.xpose.msk.msra.mxu0 %vm137_vm2, %v1292_v31  ;;  %1604 = vmatprep.mubr.msk.f32.mxu0 %vm1758_vm1, %v1757_v0 }
 0x195   :  { %1605 = vmatmul.mubr.msk.f32.vlgmr.msra.gmra.mrb[14].mxu0 %vm137_vm2, %v1290_v32 }
 0x24f   :  { %v208_v33 = vpop.f32.mrb[0].mxu1 }
 0x250   :  { %v1536_v34 = vpop.f32.mrb[1].mxu1  ;;  %v213_v35 = vsel %vm212_vm3, %v208_v33, -inf }
 0x251   :  { %214 = vmax.xlane.f32.xlu1 %v213_v35 }
 0x253   :  { %v298_v36 = vpop.f32.mrb[2].mxu1 }
 0x254   :  { %v1541_v37 = vpop.f32.mrb[3].mxu1  ;;  %v537_v38 = vpop.f32.mrb[4].mxu0  ;;  %v302_v43 = vsel %vm212_vm3, %v298_v36, -inf }
 0x255   :  { %v1556_v39 = vpop.f32.mrb[5].mxu0  ;;  %v541_v40 = vsel %vm212_vm3, %v537_v38, -inf }
 0x256   :  { %542 = vmax.xlane.f32.xlu0 %v541_v40 }
 0x258   :  { %v703_v41 = vpop.f32.mrb[6].mxu0 }
 0x259   :  { %v1566_v42 = vpop.f32.mrb[7].mxu0  ;;  %v707_v46 = vsel %vm212_vm3, %v703_v41, -inf }
 0x25a   :  { %303 = vmax.xlane.f32.xlu0 %v302_v43 }
 0x25c   :  { %v869_v44 = vpop.f32.mrb[8].mxu0 }
 0x25d   :  { %v1576_v45 = vpop.f32.mrb[9].mxu0  ;;  %v873_v49 = vsel %vm212_vm3, %v869_v44, -inf }
 0x25e   :  { %708 = vmax.xlane.f32.xlu0 %v707_v46 }
 0x260   :  { %v958_v47 = vpop.f32.mrb[10].mxu0 }
 0x261   :  { %v1581_v48 = vpop.f32.mrb[11].mxu0  ;;  %v962_v50 = vsel %vm212_vm3, %v958_v47, -inf }
 0x262   :  { %874 = vmax.xlane.f32.xlu0 %v873_v49  ;;  %963 = vmax.xlane.f32.xlu1 %v962_v50 }
 0x264   :  { %v1197_v51 = vpop.f32.mrb[12].mxu0 }
 0x265   :  { %v1596_v52 = vpop.f32.mrb[13].mxu0  ;;  %v1201_v53 = vsel %vm212_vm3, %v1197_v51, -inf }
 0x266   :  { %1202 = vmax.xlane.f32.xlu1 %v1201_v53 }
 0x268   :  { %v1363_v54 = vpop.f32.mrb[14].mxu0 }
 0x269   :  { %v1606_v55 = vpop.f32.mrb[15].mxu0  ;;  %v1367_v56 = vsel %vm212_vm3, %v1363_v54, -inf }
 0x26a   :  { %1368 = vmax.xlane.f32.xlu0 %v1367_v56 }
 0x277   :  { %314 = vrot.lane.b32.xlu1 %v1820_v16, %s1763_s11 }
 0x280   :  { %552 = vrot.lane.b32.xlu0 %v1820_v16, %s1760_s8 }
 0x2de   :  { %v215_v57 = vpop.xlane.xlu1 %214 }
 0x2df   :  { %v216_v58 = vsub.f32 %v208_v33, %v215_v57 }
 0x2e1   :  { %v217_v59 = vmul.f32 1.442695, %v216_v58 }
 0x2e3   :  { %1647 = vpow2.f32 %v217_v59  ;;  %v543_v60 = vpop.xlane.xlu0 %542 }
 0x2e4   :  { %v544_v61 = vsub.f32 %v537_v38, %v543_v60 }
 0x2e6   :  { %v545_v62 = vmul.f32 1.442695, %v544_v61 }
 0x2e7   :  { %v304_v63 = vpop.xlane.xlu0 %303 }
 0x2e8   :  { %1649 = vpow2.f32 %v545_v62  ;;  %v305_v1 = vsub.f32 %v298_v36, %v304_v63 }
 0x2ea   :  { %v306_v2 = vmul.f32 1.442695, %v305_v1 }
 0x2eb   :  { %v709_v3 = vpop.xlane.xlu0 %708 }
 0x2ec   :  { %1651 = vpow2.f32 %v306_v2  ;;  %v710_v4 = vsub.f32 %v703_v41, %v709_v3 }
 0x2ed   :  { %v1880_v5 = vpop.eup %1647 }
 0x2ee   :  { %v711_v6 = vmul.f32 1.442695, %v710_v4  ;;  %v219_v7 = vsel %vm212_vm3, %v1880_v5, 0.0 }
 0x2ef   :  { %v875_v8 = vpop.xlane.xlu0 %874  ;;  %v964_v9 = vpop.xlane.xlu1 %963  ;;  %220 = vadd.xlane.f32.xlu0 %v219_v7 }
 0x2f0   :  { %1653 = vpow2.f32 %v711_v6  ;;  %v876_v10 = vsub.f32 %v869_v44, %v875_v8  ;;  %v965_v11 = vsub.f32 %v958_v47, %v964_v9 }
 0x2f2   :  { %v1884_v12 = vpop.eup %1649  ;;  %v877_v13 = vmul.f32 1.442695, %v876_v10  ;;  %v966_v14 = vmul.f32 1.442695, %v965_v11 }
 0x2f3   :  { %v1203_v15 = vpop.xlane.xlu1 %1202  ;;  %v547_v17 = vsel %vm212_vm3, %v1884_v12, 0.0 }
 0x2f4   :  { %1655 = vpow2.f32 %v877_v13  ;;  %548 = vadd.xlane.f32.xlu1 %v547_v17  ;;  %v1204_v28 = vsub.f32 %v1197_v51, %v1203_v15 }
 0x2f5   :  { %1657 = vpow2.f32 %v966_v14 }
 0x2f6   :  { %v1652_v19 = vpop.eup %1651  ;;  %v1205_v29 = vmul.f32 1.442695, %v1204_v28 }
 0x2f7   :  { %v315_v20 = vpop.permute.xlu1 %314  ;;  %v308_v21 = vsel %vm212_vm3, %v1652_v19, 0.0  ;;  %v1369_v30 = vpop.xlane.xlu0 %1368 }
 0x2f8   :  { %309 = vadd.xlane.f32.xlu1 %v308_v21  ;;  %1543 = vmatpush3.msra.mxu1 %v315_v20  ;;  %1659 = vpow2.f32 %v1205_v29  ;;  %v1370_v31 = vsub.f32 %v1363_v54, %v1369_v30 }
 0x2f9   :  { %1547 = vmatprep.subr.mxu1 %v1757_v0 }
 0x2fa   :  { %v1654_v22 = vpop.eup %1653  ;;  %v1371_v32 = vmul.f32 1.442695, %v1370_v31 }
 0x2fb   :  { %v713_v23 = vsel %vm212_vm3, %v1654_v22, 0.0  ;;  %v553_v38 = vpop.permute.xlu0 %552 }
 0x2fc   :  { %714 = vadd.xlane.f32.xlu0 %v713_v23  ;;  %1661 = vpow2.f32 %v1371_v32 }
 0x2fe   :  { %v1891_v24 = vpop.eup %1655 }
 0x2ff   :  { %v879_v25 = vsel %vm212_vm3, %v1891_v24, 0.0  ;;  %v1658_v26 = vpop.eup %1657 }
 0x300   :  { %880 = vadd.xlane.f32.xlu0 %v879_v25  ;;  %v968_v27 = vsel %vm212_vm3, %v1658_v26, 0.0 }
 0x302   :  { %v1900_v33 = vpop.eup %1659 }
 0x303   :  { %v1207_v34 = vsel %vm212_vm3, %v1900_v33, 0.0 }
 0x304   :  { %969 = vadd.xlane.f32.xlu0 %v968_v27 }
 0x306   :  { %v1904_v35 = vpop.eup %1661 }
 0x307   :  { %v1373_v36 = vsel %vm212_vm3, %v1904_v35, 0.0 }
 0x309   :  { %974 = vrot.lane.b32.xlu1 %v1823_v18, %s1763_s11 }
 0x31a   :  { %718 = vrot.lane.b32.xlu0 %v1820_v16, %s1761_s9 }
 0x32d   :  { %1208 = vadd.xlane.f32.xlu1 %v1207_v34 }
 0x339   :  { %1374 = vadd.xlane.f32.xlu0 %v1373_v36 }
 0x33e   :  { %1378 = vrot.lane.b32.xlu1 %v1823_v18, %s1761_s9 }
 0x34f   :  { %1212 = vrot.lane.b32.xlu0 %v1823_v18, %s1760_s8 }
 0x37c   :  { %v221_v40 = vpop.xlane.xlu0 %220 }
 0x381   :  { %v549_v37 = vpop.xlane.xlu1 %548 }
 0x385   :  { %v310_v39 = vpop.xlane.xlu1 %309 }
 0x386   :  { %1663 = vrcp.f32 %v310_v39 }
 0x387   :  { %1665 = vrcp.f32 %v221_v40 }
 0x388   :  { %1667 = vrcp.f32 %v549_v37 }
 0x389   :  { %v715_v43 = vpop.xlane.xlu0 %714  ;;  %v975_v53 = vpop.permute.xlu1 %974 }
 0x38a   :  { %1669 = vrcp.f32 %v715_v43 }
 0x38d   :  { %v881_v45 = vpop.xlane.xlu0 %880 }
 0x390   :  { %v1664_v41 = vpop.eup %1663 }
 0x391   :  { %v312_v42 = vmul.f32 %v1664_v41, %v1652_v19  ;;  %v1666_v44 = vpop.eup %1665  ;;  %v970_v47 = vpop.xlane.xlu0 %969 }
 0x392   :  { %v223_v46 = vmul.f32 %v1666_v44, %v1880_v5  ;;  %1671 = vrcp.f32 %v970_v47 }
 0x393   :  { %1545 = vmatmul.mubr.msk.f32.vlgmr.msra.gmra.mrb[4].mxu1 %vm212_vm3, %v312_v42  ;;  %1673 = vrcp.f32 %v881_v45 }
 0x394   :  { %1548 = vmatpush3.msra.mxu1 %v1820_v16  ;;  %1549 = vmatprep.mubr.msk.f32.mxu1 %vm1758_vm1, %v1757_v0  ;;  %v1668_v16 = vpop.eup %1667 }
 0x395   :  { %1557 = vmatprep.subr.mxu1 %v1757_v0  ;;  %v551_v48 = vmul.f32 %v1668_v16, %v1884_v12  ;;  %v719_v49 = vpop.permute.xlu0 %718  ;;  %v1670_v50 = vpop.eup %1669 }
 0x396   :  { %v717_v51 = vmul.f32 %v1670_v50, %v1654_v22 }
 0x39b   :  { %1550 = vmatmul.mubr.msk.f32.vlgmr.msra.gmra.mrb[4].mxu1 %vm212_vm3, %v223_v46 }
 0x39c   :  { %1558 = vmatpush3.msra.mxu1 %v553_v38  ;;  %1559 = vmatprep.mubr.msk.f32.mxu1 %vm1758_vm1, %v1757_v0  ;;  %v1672_v52 = vpop.eup %1671 }
 0x39d   :  { %1567 = vmatprep.subr.mxu1 %v1757_v0  ;;  %v972_v54 = vmul.f32 %v1672_v52, %v1658_v26  ;;  %v1674_v55 = vpop.eup %1673 }
 0x39e   :  { %v883_v56 = vmul.f32 %v1674_v55, %v1891_v24 }
 0x3a3   :  { %1560 = vmatmul.mubr.msk.f32.vlgmr.msra.gmra.mrb[4].mxu1 %vm212_vm3, %v551_v48 }
 0x3a4   :  { %1568 = vmatpush3.msra.mxu1 %v719_v49  ;;  %1569 = vmatprep.mubr.msk.f32.mxu1 %vm1758_vm1, %v1757_v0 }
 0x3a5   :  { %1582 = vmatprep.subr.mxu1 %v1757_v0 }
 0x3ab   :  { %1570 = vmatmul.mubr.msk.f32.vlgmr.msra.gmra.mrb[4].mxu1 %vm212_vm3, %v717_v51 }
 0x3ac   :  { %1583 = vmatpush3.msra.mxu1 %v975_v53  ;;  %1584 = vmatprep.mubr.msk.f32.mxu1 %vm1758_vm1, %v1757_v0 }
 0x3ad   :  { %1587 = vmatprep.subr.mxu1 %v1757_v0 }
 0x3af   :  { %1585 = vmatmul.mubr.msk.f32.vlgmr.msra.gmra.mrb[6].mxu1 %vm212_vm3, %v972_v54 }
 0x3b0   :  { %1588 = vmatpush3.msra.mxu1 %v1823_v18  ;;  %1589 = vmatprep.mubr.msk.f32.mxu1 %vm1758_vm1, %v1757_v0 }
 0x3b1   :  { %1597 = vmatprep.subr.mxu1 %v1757_v0 }
 0x3b7   :  { %1590 = vmatmul.mubr.msk.f32.vlgmr.msra.gmra.mrb[6].mxu1 %vm212_vm3, %v883_v56 }
 0x3b8   :  { %1599 = vmatprep.mubr.msk.f32.mxu1 %vm1758_vm1, %v1757_v0 }
 0x3ba   :  { %v1209_v57 = vpop.xlane.xlu1 %1208 }
 0x3bb   :  { %1675 = vrcp.f32 %v1209_v57 }
 0x3be   :  { %v1379_v61 = vpop.permute.xlu1 %1378 }
 0x3c5   :  { %v1676_v59 = vpop.eup %1675 }
 0x3c6   :  { %v1375_v58 = vpop.xlane.xlu0 %1374  ;;  %v1211_v18 = vmul.f32 %v1676_v59, %v1900_v33 }
 0x3c7   :  { %1677 = vrcp.f32 %v1375_v58 }
 0x3ca   :  { %v1213_v60 = vpop.permute.xlu0 %1212 }
 0x3cb   :  { %1598 = vmatpush3.msra.mxu1 %v1213_v60 }
 0x3cc   :  { %1600 = vmatmul.mubr.msk.f32.vlgmr.msra.gmra.mrb[6].mxu1 %vm212_vm3, %v1211_v18  ;;  %1607 = vmatprep.subr.mxu1 %v1757_v0 }
 0x3cd   :  { %1608 = vmatpush3.msra.mxu1 %v1379_v61  ;;  %1609 = vmatprep.mubr.msk.f32.mxu1 %vm1758_vm1, %v1757_v0 }
 0x3d1   :  { %v1678_v62 = vpop.eup %1677 }
 0x3d2   :  { %v1377_v63 = vmul.f32 %v1678_v62, %v1904_v35 }
 0x3d4   :  { %1610 = vmatmul.mubr.msk.f32.vlgmr.msra.gmra.mrb[6].mxu1 %vm212_vm3, %v1377_v63 }
 0x47e   :  { %v790_v1 = vpop.f32.mrb[4].mxu1 }
 0x47f   :  { %795 = vst.msk [vmem:[#allocation7] sm:$0xff] %vm50_vm0, %v790_v1  ;;  %v1571_v2 = vpop.f32.mrb[5].mxu1 }
 0x4a7   :  { %v1450_v3 = vpop.f32.mrb[6].mxu1 }
 0x4a8   :  { %1455 = vst.msk [vmem:[#allocation7 + $0x8] sm:$0xff] %vm50_vm0, %v1450_v3  ;;  %v1611_v4 = vpop.f32.mrb[7].mxu1 }
 0x4a9   :  { %1734 = shalt.err (!%p1731_p6)
}
 0x4aa   :  { %s1735_s18 = scalar_lea.hbm %s1966_s2, 256 }
 0x4ab   :  { %p1736_p7 = scmp.ne.s32.totalorder %s1966_s2, %s1735_s18  ;;  %p1739_p8 = scmp.lt.u32.totalorder %s1735_s18, %s1966_s2 }
 0x4ad   :  { %p1741_p9 = pnand %p1739_p8, %p1736_p7 }
 0x4af   :  { %1744 = shalt.err (!%p1741_p9)
}
 0x4b0   :  { %1467 = dma.vmem_to_hbm [thread:$0]  %s1462_s14, 256, %s1966_s2, [#allocation4], %s1752_s19, %s1752_s19, %s1753_s20  }
 0x4b1   :  { %1749 = dma.done.wait [#allocation4], 256  }
 0x4b2   :  { %1750 = vsyncadd [#allocation4], 4294967040 }
 0x4b3   :  { %1471 = vsyncpa [#allocation3], 1 }
 0x4b4   :  { %1472 = vsyncpa [#allocation6], 1 }
 0x4b5   :  { %1473 = vsyncpa [#allocation4], 1 }

</bundles_post_ra>
